<compile_context>
chip_gen: v7x
topology: tpu7x:2x2x1
jax: 0.10.0
libtpu: 0.0.40
codegen_flags: <defaults>
</compile_context>

<pallas_src>
import jax
import jax.numpy as jnp
from jax import lax
from jax.experimental import pallas as pl
from jax.experimental.pallas import tpu as pltpu

GP = 128  # per-gate lane stride (vreg-aligned); also the padded hidden width


def lstm_kernel(seq_ref, wih_ref, whh_ref, b_ref, wlin_ref, blin_ref,
                out_ref, prex_ref):
    L = seq_ref.shape[0]

    whh = whh_ref[...]  # (GP, 4*GP) gate-stacked recurrent weights

    # Hoist the x/bias path off the serial h-dependence chain: one broadcast
    # multiply+add produces the (L, 4*GP) input pre-activation slab for every
    # step before the recurrence starts.
    prex_ref[...] = seq_ref[...] * wih_ref[...] + b_ref[...]

    def step(t, carry):
        h, c = carry                                         # (1, GP) f32 each
        pre = prex_ref[pl.ds(t, 1), :] + jnp.dot(
            h, whh, preferred_element_type=jnp.float32)      # (1, 4*GP)
        # sigmoid(x) == 0.5*tanh(0.5*x) + 0.5 : one EUP op per vreg for the
        # contiguous i|f|o slab; the scale/shift ride the VPU slot.
        s = 0.5 * jnp.tanh(0.5 * pre[:, : 3 * GP]) + 0.5
        g = jnp.tanh(pre[:, 3 * GP:])
        i_g = s[:, 0:GP]
        f_g = s[:, GP:2 * GP]
        o_g = s[:, 2 * GP:3 * GP]
        c_new = f_g * c + i_g * g
        h_new = o_g * jnp.tanh(c_new)
        return h_new, c_new

    h0 = jnp.zeros((1, GP), jnp.float32)
    c0 = jnp.zeros((1, GP), jnp.float32)
    # TODO(synk): if the bundle dump shows Mosaic re-pushing the (128,512)
    # recurrent weights every unrolled step, keep whh MXU-resident via
    # pltpu.matmul_push_rhs once before the loop + matmul_acc_lhs/matmul_pop
    # per step (per-MXU 128x128 gate blocks on v5e, two 256-wide halves on
    # v6e/v7x).
    h, _ = lax.fori_loop(0, L, step, (h0, c0), unroll=True)

    # Linear head on the final hidden state only (== pred[-1]); out_size == 1
    # so a VPU mul + XLU lane-reduce beats a 1-column MXU matmul.
    out_ref[...] = (jnp.sum(h * wlin_ref[...], axis=-1, keepdims=True)
                    + blin_ref[...])


def lstm_forward(seq, w_ih, w_hh, bias, w_lin, b_lin):
    """seq: (L,) float32. Returns (out_size,) == pred[-1] of the PyTorch module.

    w_ih: (4, input_size, H), w_hh: (4, H, H), bias: (4, 1, H) = b_ih + b_hh,
    w_lin: (H, out_size), b_lin: (1, out_size); gate order i, f, g, o.
    """
    L = seq.shape[0]
    input_size = w_ih.shape[1]
    assert input_size == 1, "kernel exploits input_size == 1 (scalar broadcast)"
    H = w_hh.shape[1]
    out_size = w_lin.shape[1]
    assert H <= GP
    assert out_size == 1, "head is a lane-reduce against one weight row"

    # Pack gates into 128-lane-strided slabs in kernel order i | f | o | g.
    order = (0, 1, 3, 2)  # PyTorch (i, f, g, o) -> kernel (i, f, o, g)
    wih_p = jnp.zeros((1, 4 * GP), jnp.float32)
    whh_p = jnp.zeros((GP, 4 * GP), jnp.float32)
    b_p = jnp.zeros((1, 4 * GP), jnp.float32)
    for slot, g in enumerate(order):
        c0 = slot * GP
        wih_p = wih_p.at[0, c0:c0 + H].set(w_ih[g, 0, :].astype(jnp.float32))
        whh_p = whh_p.at[:H, c0:c0 + H].set(w_hh[g].astype(jnp.float32))
        b_p = b_p.at[0, c0:c0 + H].set(bias[g, 0, :].astype(jnp.float32))
    # Head weights as a single lane-aligned row (transposed, zero-padded).
    wlin_row = jnp.zeros((1, GP), jnp.float32).at[0, :H].set(
        w_lin[:, 0].astype(jnp.float32))
    blin_p = b_lin.astype(jnp.float32).reshape(1, out_size)
    seq_col = seq.astype(jnp.float32).reshape(L, 1)

    out = pl.pallas_call(
        lstm_kernel,
        out_shape=jax.ShapeDtypeStruct((1, out_size), jnp.float32),
        in_specs=[
            pl.BlockSpec(memory_space=pltpu.MemorySpace.VMEM),   # seq (L, 1)
            pl.BlockSpec(memory_space=pltpu.MemorySpace.VMEM),   # w_ih row
            pl.BlockSpec(memory_space=pltpu.MemorySpace.VMEM),   # w_hh stacked
            pl.BlockSpec(memory_space=pltpu.MemorySpace.VMEM),   # bias stacked
            pl.BlockSpec(memory_space=pltpu.MemorySpace.VMEM),   # w_lin row
            pl.BlockSpec(memory_space=pltpu.MemorySpace.VMEM),   # b_lin
        ],
        out_specs=pl.BlockSpec(memory_space=pltpu.MemorySpace.VMEM),
        scratch_shapes=[pltpu.VMEM((L, 4 * GP), jnp.float32)],   # pre_x slab
    )(seq_col, wih_p, whh_p, b_p, wlin_row, blin_p)
    return out[0]


def lstm_reference(seq, w_ih, w_hh, bias, w_lin, b_lin):
    """Pure-JAX reference matching PyTorch nn.LSTM (gate order i, f, g, o)."""
    L = seq.shape[0]
    input_size = w_ih.shape[1]
    H = w_hh.shape[1]
    x = seq.reshape(L, input_size).astype(jnp.float32)
    h = jnp.zeros((1, H), jnp.float32)
    c = jnp.zeros((1, H), jnp.float32)
    for t in range(L):
        xt = x[t:t + 1]
        pre = [xt @ w_ih[g] + h @ w_hh[g] + bias[g] for g in range(4)]
        i_g = jax.nn.sigmoid(pre[0])
        f_g = jax.nn.sigmoid(pre[1])
        g_g = jnp.tanh(pre[2])
        o_g = jax.nn.sigmoid(pre[3])
        c = f_g * c + i_g * g_g
        h = o_g * jnp.tanh(c)
    return (h @ w_lin + b_lin)[0]


def init_params(key, input_size=1, hidden_size=50, out_size=1):
    # PyTorch default: uniform(-1/sqrt(H), 1/sqrt(H)) for all LSTM params,
    # uniform(-1/sqrt(in), 1/sqrt(in)) for Linear. Deterministic via PRNGKey.
    H = hidden_size
    k = jax.random.split(key, 6)
    s = 1.0 / jnp.sqrt(H)
    w_ih = jax.random.uniform(k[0], (4, input_size, H), jnp.float32, -s, s)
    w_hh = jax.random.uniform(k[1], (4, H, H), jnp.float32, -s, s)
    b_ih = jax.random.uniform(k[2], (4, 1, H), jnp.float32, -s, s)
    b_hh = jax.random.uniform(k[3], (4, 1, H), jnp.float32, -s, s)
    bias = b_ih + b_hh
    s_lin = 1.0 / jnp.sqrt(H)
    w_lin = jax.random.uniform(k[4], (H, out_size), jnp.float32, -s_lin, s_lin)
    b_lin = jax.random.uniform(k[5], (1, out_size), jnp.float32, -s_lin, s_lin)
    return w_ih, w_hh, bias, w_lin, b_lin


if __name__ == "__main__":
    key = jax.random.PRNGKey(0)
    k_param, k_seq = jax.random.split(key)

    input_size, hidden_size, out_size = 1, 50, 1
    seq_len = 8

    params = init_params(k_param, input_size, hidden_size, out_size)
    seq = jax.random.normal(k_seq, (seq_len,), jnp.float32)

    pred = lstm_forward(seq, *params)
    pred = jax.block_until_ready(pred)

    ref = lstm_reference(seq, *params)
    assert pred.shape == (out_size,)
    assert jnp.allclose(pred, ref, atol=1e-4, rtol=1e-4), (pred, ref)

    print("KERNEL_OK")
</pallas_src>

<mosaic_0001>
module attributes {stable_mosaic.version = 11 : i64} {
  func.func @lstm_kernel(%arg0: memref<8x1xf32, #tpu.memory_space<vmem>>, %arg1: memref<1x512xf32, #tpu.memory_space<vmem>>, %arg2: memref<128x512xf32, #tpu.memory_space<vmem>>, %arg3: memref<1x512xf32, #tpu.memory_space<vmem>>, %arg4: memref<1x128xf32, #tpu.memory_space<vmem>>, %arg5: memref<1x1xf32, #tpu.memory_space<vmem>>, %arg6: memref<1x1xf32, #tpu.memory_space<vmem>>, %arg7: memref<8x512xf32, #tpu.memory_space<vmem>>) attributes {dimension_semantics = [], scalar_prefetch = 0 : i64, scratch_operands = 1 : i64, tpu.core_type = #tpu.core_type<tc>} {
    %c0 = arith.constant 0 : index
    %c0_0 = arith.constant 0 : index
    %0 = vector.load %arg2[%c0, %c0_0] : memref<128x512xf32, #tpu.memory_space<vmem>>, vector<128x512xf32>
    %c0_1 = arith.constant 0 : index
    %c0_2 = arith.constant 0 : index
    %1 = vector.load %arg0[%c0_1, %c0_2] : memref<8x1xf32, #tpu.memory_space<vmem>>, vector<8x1xf32>
    %c0_3 = arith.constant 0 : index
    %c0_4 = arith.constant 0 : index
    %2 = vector.load %arg1[%c0_3, %c0_4] : memref<1x512xf32, #tpu.memory_space<vmem>>, vector<1x512xf32>
    %3 = vector.broadcast %1 : vector<8x1xf32> to vector<8x512xf32>
    %4 = vector.broadcast %2 : vector<1x512xf32> to vector<8x512xf32>
    %5 = arith.mulf %3, %4 : vector<8x512xf32>
    %c0_5 = arith.constant 0 : index
    %c0_6 = arith.constant 0 : index
    %6 = vector.load %arg3[%c0_5, %c0_6] : memref<1x512xf32, #tpu.memory_space<vmem>>, vector<1x512xf32>
    %7 = vector.broadcast %6 : vector<1x512xf32> to vector<8x512xf32>
    %8 = arith.addf %5, %7 : vector<8x512xf32>
    %c0_7 = arith.constant 0 : index
    %c0_8 = arith.constant 0 : index
    %9 = vector.load %arg7[%c0_7, %c0_8] : memref<8x512xf32, #tpu.memory_space<vmem>>, vector<8x512xf32>
    tpu.vector_store %arg7[%c0_7, %c0_8], %8 {strides = array<i32>} : memref<8x512xf32, #tpu.memory_space<vmem>>, vector<8x512xf32>,
    %cst = arith.constant 0.000000e+00 : f32
    %10 = vector.broadcast %cst : f32 to vector<1x128xf32>
    %cst_9 = arith.constant 0.000000e+00 : f32
    %11 = vector.broadcast %cst_9 : f32 to vector<1x128xf32>
    %c0_i32 = arith.constant 0 : i32
    %12 = arith.index_cast %c0_i32 : i32 to index
    %c0_10 = arith.constant 0 : index
    %13 = vector.load %arg7[%12, %c0_10] : memref<8x512xf32, #tpu.memory_space<vmem>>, vector<1x512xf32>
    %cst_11 = arith.constant dense<0.000000e+00> : vector<1x512xf32>
    %14 = tpu.matmul %10, %0, %cst_11 {dimension_numbers = #tpu.dot_dimension_numbers<[1], [0], [0], [1], [0, 0, 1, 1], [], []>} : vector<1x128xf32>, vector<128x512xf32>, vector<1x512xf32> -> vector<1x512xf32>
    %15 = arith.addf %13, %14 : vector<1x512xf32>
    %16 = vector.extract_strided_slice %15 {offsets = [0, 0], sizes = [1, 384], strides = [1, 1]} : vector<1x512xf32> to vector<1x384xf32>
    %cst_12 = arith.constant 5.000000e-01 : f32
    %17 = vector.broadcast %cst_12 : f32 to vector<1x384xf32>
    %18 = arith.mulf %17, %16 : vector<1x384xf32>
    %19 = math.tanh %18 : vector<1x384xf32>
    %cst_13 = arith.constant 5.000000e-01 : f32
    %20 = vector.broadcast %cst_13 : f32 to vector<1x384xf32>
    %21 = arith.mulf %20, %19 : vector<1x384xf32>
    %cst_14 = arith.constant 5.000000e-01 : f32
    %22 = vector.broadcast %cst_14 : f32 to vector<1x384xf32>
    %23 = arith.addf %21, %22 : vector<1x384xf32>
    %24 = vector.extract_strided_slice %15 {offsets = [0, 384], sizes = [1, 128], strides = [1, 1]} : vector<1x512xf32> to vector<1x128xf32>
    %25 = math.tanh %24 : vector<1x128xf32>
    %26 = vector.extract_strided_slice %23 {offsets = [0, 0], sizes = [1, 128], strides = [1, 1]} : vector<1x384xf32> to vector<1x128xf32>
    %27 = vector.extract_strided_slice %23 {offsets = [0, 128], sizes = [1, 128], strides = [1, 1]} : vector<1x384xf32> to vector<1x128xf32>
    %28 = vector.extract_strided_slice %23 {offsets = [0, 256], sizes = [1, 128], strides = [1, 1]} : vector<1x384xf32> to vector<1x128xf32>
    %29 = arith.mulf %27, %11 : vector<1x128xf32>
    %30 = arith.mulf %26, %25 : vector<1x128xf32>
    %31 = arith.addf %29, %30 : vector<1x128xf32>
    %32 = math.tanh %31 : vector<1x128xf32>
    %33 = arith.mulf %28, %32 : vector<1x128xf32>
    %c1_i32 = arith.constant 1 : i32
    %34 = arith.index_cast %c1_i32 : i32 to index
    %c0_15 = arith.constant 0 : index
    %35 = vector.load %arg7[%34, %c0_15] : memref<8x512xf32, #tpu.memory_space<vmem>>, vector<1x512xf32>
    %cst_16 = arith.constant dense<0.000000e+00> : vector<1x512xf32>
    %36 = tpu.matmul %33, %0, %cst_16 {dimension_numbers = #tpu.dot_dimension_numbers<[1], [0], [0], [1], [0, 0, 1, 1], [], []>} : vector<1x128xf32>, vector<128x512xf32>, vector<1x512xf32> -> vector<1x512xf32>
    %37 = arith.addf %35, %36 : vector<1x512xf32>
    %38 = vector.extract_strided_slice %37 {offsets = [0, 0], sizes = [1, 384], strides = [1, 1]} : vector<1x512xf32> to vector<1x384xf32>
    %cst_17 = arith.constant 5.000000e-01 : f32
    %39 = vector.broadcast %cst_17 : f32 to vector<1x384xf32>
    %40 = arith.mulf %39, %38 : vector<1x384xf32>
    %41 = math.tanh %40 : vector<1x384xf32>
    %cst_18 = arith.constant 5.000000e-01 : f32
    %42 = vector.broadcast %cst_18 : f32 to vector<1x384xf32>
    %43 = arith.mulf %42, %41 : vector<1x384xf32>
    %cst_19 = arith.constant 5.000000e-01 : f32
    %44 = vector.broadcast %cst_19 : f32 to vector<1x384xf32>
    %45 = arith.addf %43, %44 : vector<1x384xf32>
    %46 = vector.extract_strided_slice %37 {offsets = [0, 384], sizes = [1, 128], strides = [1, 1]} : vector<1x512xf32> to vector<1x128xf32>
    %47 = math.tanh %46 : vector<1x128xf32>
    %48 = vector.extract_strided_slice %45 {offsets = [0, 0], sizes = [1, 128], strides = [1, 1]} : vector<1x384xf32> to vector<1x128xf32>
    %49 = vector.extract_strided_slice %45 {offsets = [0, 128], sizes = [1, 128], strides = [1, 1]} : vector<1x384xf32> to vector<1x128xf32>
    %50 = vector.extract_strided_slice %45 {offsets = [0, 256], sizes = [1, 128], strides = [1, 1]} : vector<1x384xf32> to vector<1x128xf32>
    %51 = arith.mulf %49, %31 : vector<1x128xf32>
    %52 = arith.mulf %48, %47 : vector<1x128xf32>
    %53 = arith.addf %51, %52 : vector<1x128xf32>
    %54 = math.tanh %53 : vector<1x128xf32>
    %55 = arith.mulf %50, %54 : vector<1x128xf32>
    %c2_i32 = arith.constant 2 : i32
    %56 = arith.index_cast %c2_i32 : i32 to index
    %c0_20 = arith.constant 0 : index
    %57 = vector.load %arg7[%56, %c0_20] : memref<8x512xf32, #tpu.memory_space<vmem>>, vector<1x512xf32>
    %cst_21 = arith.constant dense<0.000000e+00> : vector<1x512xf32>
    %58 = tpu.matmul %55, %0, %cst_21 {dimension_numbers = #tpu.dot_dimension_numbers<[1], [0], [0], [1], [0, 0, 1, 1], [], []>} : vector<1x128xf32>, vector<128x512xf32>, vector<1x512xf32> -> vector<1x512xf32>
    %59 = arith.addf %57, %58 : vector<1x512xf32>
    %60 = vector.extract_strided_slice %59 {offsets = [0, 0], sizes = [1, 384], strides = [1, 1]} : vector<1x512xf32> to vector<1x384xf32>
    %cst_22 = arith.constant 5.000000e-01 : f32
    %61 = vector.broadcast %cst_22 : f32 to vector<1x384xf32>
    %62 = arith.mulf %61, %60 : vector<1x384xf32>
    %63 = math.tanh %62 : vector<1x384xf32>
    %cst_23 = arith.constant 5.000000e-01 : f32
    %64 = vector.broadcast %cst_23 : f32 to vector<1x384xf32>
    %65 = arith.mulf %64, %63 : vector<1x384xf32>
    %cst_24 = arith.constant 5.000000e-01 : f32
    %66 = vector.broadcast %cst_24 : f32 to vector<1x384xf32>
    %67 = arith.addf %65, %66 : vector<1x384xf32>
    %68 = vector.extract_strided_slice %59 {offsets = [0, 384], sizes = [1, 128], strides = [1, 1]} : vector<1x512xf32> to vector<1x128xf32>
    %69 = math.tanh %68 : vector<1x128xf32>
    %70 = vector.extract_strided_slice %67 {offsets = [0, 0], sizes = [1, 128], strides = [1, 1]} : vector<1x384xf32> to vector<1x128xf32>
    %71 = vector.extract_strided_slice %67 {offsets = [0, 128], sizes = [1, 128], strides = [1, 1]} : vector<1x384xf32> to vector<1x128xf32>
    %72 = vector.extract_strided_slice %67 {offsets = [0, 256], sizes = [1, 128], strides = [1, 1]} : vector<1x384xf32> to vector<1x128xf32>
    %73 = arith.mulf %71, %53 : vector<1x128xf32>
    %74 = arith.mulf %70, %69 : vector<1x128xf32>
    %75 = arith.addf %73, %74 : vector<1x128xf32>
    %76 = math.tanh %75 : vector<1x128xf32>
    %77 = arith.mulf %72, %76 : vector<1x128xf32>
    %c3_i32 = arith.constant 3 : i32
    %78 = arith.index_cast %c3_i32 : i32 to index
    %c0_25 = arith.constant 0 : index
    %79 = vector.load %arg7[%78, %c0_25] : memref<8x512xf32, #tpu.memory_space<vmem>>, vector<1x512xf32>
    %cst_26 = arith.constant dense<0.000000e+00> : vector<1x512xf32>
    %80 = tpu.matmul %77, %0, %cst_26 {dimension_numbers = #tpu.dot_dimension_numbers<[1], [0], [0], [1], [0, 0, 1, 1], [], []>} : vector<1x128xf32>, vector<128x512xf32>, vector<1x512xf32> -> vector<1x512xf32>
    %81 = arith.addf %79, %80 : vector<1x512xf32>
    %82 = vector.extract_strided_slice %81 {offsets = [0, 0], sizes = [1, 384], strides = [1, 1]} : vector<1x512xf32> to vector<1x384xf32>
    %cst_27 = arith.constant 5.000000e-01 : f32
    %83 = vector.broadcast %cst_27 : f32 to vector<1x384xf32>
    %84 = arith.mulf %83, %82 : vector<1x384xf32>
    %85 = math.tanh %84 : vector<1x384xf32>
    %cst_28 = arith.constant 5.000000e-01 : f32
    %86 = vector.broadcast %cst_28 : f32 to vector<1x384xf32>
    %87 = arith.mulf %86, %85 : vector<1x384xf32>
    %cst_29 = arith.constant 5.000000e-01 : f32
    %88 = vector.broadcast %cst_29 : f32 to vector<1x384xf32>
    %89 = arith.addf %87, %88 : vector<1x384xf32>
    %90 = vector.extract_strided_slice %81 {offsets = [0, 384], sizes = [1, 128], strides = [1, 1]} : vector<1x512xf32> to vector<1x128xf32>
    %91 = math.tanh %90 : vector<1x128xf32>
    %92 = vector.extract_strided_slice %89 {offsets = [0, 0], sizes = [1, 128], strides = [1, 1]} : vector<1x384xf32> to vector<1x128xf32>
    %93 = vector.extract_strided_slice %89 {offsets = [0, 128], sizes = [1, 128], strides = [1, 1]} : vector<1x384xf32> to vector<1x128xf32>
    %94 = vector.extract_strided_slice %89 {offsets = [0, 256], sizes = [1, 128], strides = [1, 1]} : vector<1x384xf32> to vector<1x128xf32>
    %95 = arith.mulf %93, %75 : vector<1x128xf32>
    %96 = arith.mulf %92, %91 : vector<1x128xf32>
    %97 = arith.addf %95, %96 : vector<1x128xf32>
    %98 = math.tanh %97 : vector<1x128xf32>
    %99 = arith.mulf %94, %98 : vector<1x128xf32>
    %c4_i32 = arith.constant 4 : i32
    %100 = arith.index_cast %c4_i32 : i32 to index
    %c0_30 = arith.constant 0 : index
    %101 = vector.load %arg7[%100, %c0_30] : memref<8x512xf32, #tpu.memory_space<vmem>>, vector<1x512xf32>
    %cst_31 = arith.constant dense<0.000000e+00> : vector<1x512xf32>
    %102 = tpu.matmul %99, %0, %cst_31 {dimension_numbers = #tpu.dot_dimension_numbers<[1], [0], [0], [1], [0, 0, 1, 1], [], []>} : vector<1x128xf32>, vector<128x512xf32>, vector<1x512xf32> -> vector<1x512xf32>
    %103 = arith.addf %101, %102 : vector<1x512xf32>
    %104 = vector.extract_strided_slice %103 {offsets = [0, 0], sizes = [1, 384], strides = [1, 1]} : vector<1x512xf32> to vector<1x384xf32>
    %cst_32 = arith.constant 5.000000e-01 : f32
    %105 = vector.broadcast %cst_32 : f32 to vector<1x384xf32>
    %106 = arith.mulf %105, %104 : vector<1x384xf32>
    %107 = math.tanh %106 : vector<1x384xf32>
    %cst_33 = arith.constant 5.000000e-01 : f32
    %108 = vector.broadcast %cst_33 : f32 to vector<1x384xf32>
    %109 = arith.mulf %108, %107 : vector<1x384xf32>
    %cst_34 = arith.constant 5.000000e-01 : f32
    %110 = vector.broadcast %cst_34 : f32 to vector<1x384xf32>
    %111 = arith.addf %109, %110 : vector<1x384xf32>
    %112 = vector.extract_strided_slice %103 {offsets = [0, 384], sizes = [1, 128], strides = [1, 1]} : vector<1x512xf32> to vector<1x128xf32>
    %113 = math.tanh %112 : vector<1x128xf32>
    %114 = vector.extract_strided_slice %111 {offsets = [0, 0], sizes = [1, 128], strides = [1, 1]} : vector<1x384xf32> to vector<1x128xf32>
    %115 = vector.extract_strided_slice %111 {offsets = [0, 128], sizes = [1, 128], strides = [1, 1]} : vector<1x384xf32> to vector<1x128xf32>
    %116 = vector.extract_strided_slice %111 {offsets = [0, 256], sizes = [1, 128], strides = [1, 1]} : vector<1x384xf32> to vector<1x128xf32>
    %117 = arith.mulf %115, %97 : vector<1x128xf32>
    %118 = arith.mulf %114, %113 : vector<1x128xf32>
    %119 = arith.addf %117, %118 : vector<1x128xf32>
    %120 = math.tanh %119 : vector<1x128xf32>
    %121 = arith.mulf %116, %120 : vector<1x128xf32>
    %c5_i32 = arith.constant 5 : i32
    %122 = arith.index_cast %c5_i32 : i32 to index
    %c0_35 = arith.constant 0 : index
    %123 = vector.load %arg7[%122, %c0_35] : memref<8x512xf32, #tpu.memory_space<vmem>>, vector<1x512xf32>
    %cst_36 = arith.constant dense<0.000000e+00> : vector<1x512xf32>
    %124 = tpu.matmul %121, %0, %cst_36 {dimension_numbers = #tpu.dot_dimension_numbers<[1], [0], [0], [1], [0, 0, 1, 1], [], []>} : vector<1x128xf32>, vector<128x512xf32>, vector<1x512xf32> -> vector<1x512xf32>
    %125 = arith.addf %123, %124 : vector<1x512xf32>
    %126 = vector.extract_strided_slice %125 {offsets = [0, 0], sizes = [1, 384], strides = [1, 1]} : vector<1x512xf32> to vector<1x384xf32>
    %cst_37 = arith.constant 5.000000e-01 : f32
    %127 = vector.broadcast %cst_37 : f32 to vector<1x384xf32>
    %128 = arith.mulf %127, %126 : vector<1x384xf32>
    %129 = math.tanh %128 : vector<1x384xf32>
    %cst_38 = arith.constant 5.000000e-01 : f32
    %130 = vector.broadcast %cst_38 : f32 to vector<1x384xf32>
    %131 = arith.mulf %130, %129 : vector<1x384xf32>
    %cst_39 = arith.constant 5.000000e-01 : f32
    %132 = vector.broadcast %cst_39 : f32 to vector<1x384xf32>
    %133 = arith.addf %131, %132 : vector<1x384xf32>
    %134 = vector.extract_strided_slice %125 {offsets = [0, 384], sizes = [1, 128], strides = [1, 1]} : vector<1x512xf32> to vector<1x128xf32>
    %135 = math.tanh %134 : vector<1x128xf32>
    %136 = vector.extract_strided_slice %133 {offsets = [0, 0], sizes = [1, 128], strides = [1, 1]} : vector<1x384xf32> to vector<1x128xf32>
    %137 = vector.extract_strided_slice %133 {offsets = [0, 128], sizes = [1, 128], strides = [1, 1]} : vector<1x384xf32> to vector<1x128xf32>
    %138 = vector.extract_strided_slice %133 {offsets = [0, 256], sizes = [1, 128], strides = [1, 1]} : vector<1x384xf32> to vector<1x128xf32>
    %139 = arith.mulf %137, %119 : vector<1x128xf32>
    %140 = arith.mulf %136, %135 : vector<1x128xf32>
    %141 = arith.addf %139, %140 : vector<1x128xf32>
    %142 = math.tanh %141 : vector<1x128xf32>
    %143 = arith.mulf %138, %142 : vector<1x128xf32>
    %c6_i32 = arith.constant 6 : i32
    %144 = arith.index_cast %c6_i32 : i32 to index
    %c0_40 = arith.constant 0 : index
    %145 = vector.load %arg7[%144, %c0_40] : memref<8x512xf32, #tpu.memory_space<vmem>>, vector<1x512xf32>
    %cst_41 = arith.constant dense<0.000000e+00> : vector<1x512xf32>
    %146 = tpu.matmul %143, %0, %cst_41 {dimension_numbers = #tpu.dot_dimension_numbers<[1], [0], [0], [1], [0, 0, 1, 1], [], []>} : vector<1x128xf32>, vector<128x512xf32>, vector<1x512xf32> -> vector<1x512xf32>
    %147 = arith.addf %145, %146 : vector<1x512xf32>
    %148 = vector.extract_strided_slice %147 {offsets = [0, 0], sizes = [1, 384], strides = [1, 1]} : vector<1x512xf32> to vector<1x384xf32>
    %cst_42 = arith.constant 5.000000e-01 : f32
    %149 = vector.broadcast %cst_42 : f32 to vector<1x384xf32>
    %150 = arith.mulf %149, %148 : vector<1x384xf32>
    %151 = math.tanh %150 : vector<1x384xf32>
    %cst_43 = arith.constant 5.000000e-01 : f32
    %152 = vector.broadcast %cst_43 : f32 to vector<1x384xf32>
    %153 = arith.mulf %152, %151 : vector<1x384xf32>
    %cst_44 = arith.constant 5.000000e-01 : f32
    %154 = vector.broadcast %cst_44 : f32 to vector<1x384xf32>
    %155 = arith.addf %153, %154 : vector<1x384xf32>
    %156 = vector.extract_strided_slice %147 {offsets = [0, 384], sizes = [1, 128], strides = [1, 1]} : vector<1x512xf32> to vector<1x128xf32>
    %157 = math.tanh %156 : vector<1x128xf32>
    %158 = vector.extract_strided_slice %155 {offsets = [0, 0], sizes = [1, 128], strides = [1, 1]} : vector<1x384xf32> to vector<1x128xf32>
    %159 = vector.extract_strided_slice %155 {offsets = [0, 128], sizes = [1, 128], strides = [1, 1]} : vector<1x384xf32> to vector<1x128xf32>
    %160 = vector.extract_strided_slice %155 {offsets = [0, 256], sizes = [1, 128], strides = [1, 1]} : vector<1x384xf32> to vector<1x128xf32>
    %161 = arith.mulf %159, %141 : vector<1x128xf32>
    %162 = arith.mulf %158, %157 : vector<1x128xf32>
    %163 = arith.addf %161, %162 : vector<1x128xf32>
    %164 = math.tanh %163 : vector<1x128xf32>
    %165 = arith.mulf %160, %164 : vector<1x128xf32>
    %c7_i32 = arith.constant 7 : i32
    %166 = arith.index_cast %c7_i32 : i32 to index
    %c0_45 = arith.constant 0 : index
    %167 = vector.load %arg7[%166, %c0_45] : memref<8x512xf32, #tpu.memory_space<vmem>>, vector<1x512xf32>
    %cst_46 = arith.constant dense<0.000000e+00> : vector<1x512xf32>
    %168 = tpu.matmul %165, %0, %cst_46 {dimension_numbers = #tpu.dot_dimension_numbers<[1], [0], [0], [1], [0, 0, 1, 1], [], []>} : vector<1x128xf32>, vector<128x512xf32>, vector<1x512xf32> -> vector<1x512xf32>
    %169 = arith.addf %167, %168 : vector<1x512xf32>
    %170 = vector.extract_strided_slice %169 {offsets = [0, 0], sizes = [1, 384], strides = [1, 1]} : vector<1x512xf32> to vector<1x384xf32>
    %cst_47 = arith.constant 5.000000e-01 : f32
    %171 = vector.broadcast %cst_47 : f32 to vector<1x384xf32>
    %172 = arith.mulf %171, %170 : vector<1x384xf32>
    %173 = math.tanh %172 : vector<1x384xf32>
    %cst_48 = arith.constant 5.000000e-01 : f32
    %174 = vector.broadcast %cst_48 : f32 to vector<1x384xf32>
    %175 = arith.mulf %174, %173 : vector<1x384xf32>
    %cst_49 = arith.constant 5.000000e-01 : f32
    %176 = vector.broadcast %cst_49 : f32 to vector<1x384xf32>
    %177 = arith.addf %175, %176 : vector<1x384xf32>
    %178 = vector.extract_strided_slice %169 {offsets = [0, 384], sizes = [1, 128], strides = [1, 1]} : vector<1x512xf32> to vector<1x128xf32>
    %179 = math.tanh %178 : vector<1x128xf32>
    %180 = vector.extract_strided_slice %177 {offsets = [0, 0], sizes = [1, 128], strides = [1, 1]} : vector<1x384xf32> to vector<1x128xf32>
    %181 = vector.extract_strided_slice %177 {offsets = [0, 128], sizes = [1, 128], strides = [1, 1]} : vector<1x384xf32> to vector<1x128xf32>
    %182 = vector.extract_strided_slice %177 {offsets = [0, 256], sizes = [1, 128], strides = [1, 1]} : vector<1x384xf32> to vector<1x128xf32>
    %183 = arith.mulf %181, %163 : vector<1x128xf32>
    %184 = arith.mulf %180, %179 : vector<1x128xf32>
    %185 = arith.addf %183, %184 : vector<1x128xf32>
    %186 = math.tanh %185 : vector<1x128xf32>
    %187 = arith.mulf %182, %186 : vector<1x128xf32>
    %c8_i32 = arith.constant 8 : i32
    %c0_50 = arith.constant 0 : index
    %c0_51 = arith.constant 0 : index
    %188 = vector.load %arg4[%c0_50, %c0_51] : memref<1x128xf32, #tpu.memory_space<vmem>>, vector<1x128xf32>
    %189 = arith.mulf %187, %188 : vector<1x128xf32>
    %cst_52 = arith.constant dense<0.000000e+00> : vector<1xf32>
    %190 = vector.multi_reduction <add>, %189, %cst_52 [1] : vector<1x128xf32> to vector<1xf32>
    %191 = vector.shape_cast %190 : vector<1xf32> to vector<1x1xf32>
    %c0_53 = arith.constant 0 : index
    %c0_54 = arith.constant 0 : index
    %192 = vector.load %arg5[%c0_53, %c0_54] : memref<1x1xf32, #tpu.memory_space<vmem>>, vector<1x1xf32>
    %193 = arith.addf %191, %192 : vector<1x1xf32>
    %c0_55 = arith.constant 0 : index
    %c0_56 = arith.constant 0 : index
    %194 = vector.load %arg6[%c0_55, %c0_56] : memref<1x1xf32, #tpu.memory_space<vmem>>, vector<1x1xf32>
    tpu.vector_store %arg6[%c0_55, %c0_56], %193 {strides = array<i32>} : memref<1x1xf32, #tpu.memory_space<vmem>>, vector<1x1xf32>,
    return
  }
}

</mosaic_0001>

<bundles_post_ra>
// kernel: tpu_custom_call.1
= control target key start
LH: loop header
LB: loop body
LE: loop exit
PB: predicated region body
PF: predicated region fallthrough
CT: control target
= control target key end

     0   :  { %s2787_s0 = inlined_call_operand.vmem [shape: f32[8,1], index: 0, kind: input, shape index: {}]   ;;  %s2788_s1 = inlined_call_operand.vmem [shape: f32[1,512], index: 1, kind: input, shape index: {}]   ;;  %s2789_s2 = inlined_call_operand.hbm [shape: f32[128,512], index: 2, kind: input, shape index: {}]   ;;  %s2790_s3 = inlined_call_operand.vmem [shape: f32[1,512], index: 3, kind: input, shape index: {}]   ;;  %s2791_s4 = inlined_call_operand.vmem [shape: f32[1,128], index: 4, kind: input, shape index: {}]   ;;  %s2792_s5 = inlined_call_operand.<no memory space> [shape: f32[1,1], index: 5, kind: input, shape index: {}]   ;;  %s2793_s6 = inlined_call_operand.hbm [shape: f32[1,1], index: 6, kind: output, shape index: {}]  }
   0x1   :  { %v11_v0 = vstv %s2792_s5 }
   0x2   :  { %12 = vst [vmem:[#allocation3] sm:$0x1] %v11_v0 }
   0x3   :  { %13 = vsyncpa [#allocation5], 0 }
   0x4   :  { %14 = vsyncpa [#allocation6], 0  ;;  %s2342_s23 = smov [#allocation4]   ;;  %s2294_s27 = scalar_lea.hbm %s2789_s2, 8192 }
   0x5   :  { %s24_s24 = sshll.u32 %s2342_s23, 4  ;;  %p2295_p0 = scmp.ne.s32.totalorder %s2789_s2, %s2294_s27  ;;  %s25_s24 = int_to_ptr.vmem [resolvable:$true] %s24_s24 }
   0x6   :  { %p2298_p1 = scmp.lt.u32.totalorder %s2294_s27, %s2789_s2 }
   0x8   :  { %p2300_p2 = pnand %p2298_p1, %p2295_p0 }
   0xa   :  { %2303 = shalt.err (!%p2300_p2)
}
   0xb   :  { %s2304_s5 = scalar_lea.vmem %s25_s24, 8192  ;;  %p2309_p4 = scmp.lt.s32.totalorder %s25_s24, %s25_s24 }
   0xc   :  { %p2305_p3 = scmp.ne.s32.totalorder %s25_s24, %s2304_s5  ;;  %p2310_p5 = scmp.lt.s32.totalorder %s2304_s5, %s2304_s5 }
   0xe   :  { %p2311_p6 = por %p2310_p5, %p2309_p4 }
  0x10   :  { %p2312_p7 = pnand %p2311_p6, %p2305_p3 }
  0x12   :  { %2315 = shalt.err (!%p2312_p7)
}
  0x13   :  { %s2343_s8 = smov 512   ;;  %s2344_s9 = smov 32  }
  0x14   :  { %30 = dma.hbm_to_vmem [thread:$0]  %s2789_s2, 8192, %s25_s24, [#allocation5], %s2343_s8, %s2343_s8, %s2344_s9  }
  0x15   :  { %2338 = dma.done.wait [#allocation5], 8192  }
  0x16   :  { %2339 = vsyncadd [#allocation5], 4294959104  ;;  %v2345_v1 = vmov 0.0   ;;  %v2346_v2 = vmov 0   ;;  %v41_v3 = vld [vmem:[#allocation4 + $0x8] sm:$0xff]  ;;  %v43_v5 = vld [vmem:[#allocation4 + $0x18] sm:$0xff] }
  0x17   :  { %231 = vmatprep.mubr.f32.mxu0 %v2345_v1  ;;  %302 = vmatprep.mubr.f32.mxu1 %v2345_v1  ;;  %v45_v4 = vld [vmem:[#allocation4 + $0x28] sm:$0xff]  ;;  %v47_v7 = vld [vmem:[#allocation4 + $0x38] sm:$0xff]  ;;  %v40_v8 = vld [vmem:[#allocation4] sm:$0xff]  ;;  %vm1703_vm0 = vcmask 1040384   ;;  %s2348_s16 = smov [#allocation7]   ;;  %vm1709_vm1 = vcmask 0  }
  0x18   :  { %2245 = vset.pattern.permute.xlu0 %v2346_v2  ;;  %v2401_v6 = vpack.c.bf16 %v45_v4, %v41_v3  ;;  %v44_v9 = vld [vmem:[#allocation4 + $0x20] sm:$0xff]  ;;  %v2403_v10 = vpack.c.bf16 %v47_v7, %v43_v5  ;;  %v42_v12 = vld [vmem:[#allocation4 + $0x10] sm:$0xff]  ;;  %v49_v14 = vld [vmem:[#allocation4 + $0x48] sm:$0xff]  ;;  %s1717_s17 = sshll.u32 %s2348_s16, 4  ;;  %s1718_s17 = int_to_ptr.vmem [resolvable:$true] %s1717_s17 }
  0x19   :  { %v2405_v11 = vpack.c.bf16 %v44_v9, %v40_v8  ;;  %v46_v13 = vld [vmem:[#allocation4 + $0x30] sm:$0xff]  ;;  %v53_v16 = vld [vmem:[#allocation4 + $0x68] sm:$0xff]  ;;  %v51_v17 = vld [vmem:[#allocation4 + $0x58] sm:$0xff]  ;;  %s2316_s18 = scalar_lea.vmem %s1718_s17, 16  ;;  %s2320_s19 = scalar_lea.vmem %s1718_s17, 32 }
  0x1a   :  { %1727 = vmatprep.subr.bf16.mxu0 %v2401_v6  ;;  %v2408_v15 = vpack.c.bf16 %v46_v13, %v42_v12  ;;  %v55_v18 = vld [vmem:[#allocation4 + $0x78] sm:$0xff]  ;;  %1759 = vmatprep.subr.bf16.mxu1 %v2403_v10  ;;  %v2412_v19 = vpack.c.bf16 %v53_v16, %v49_v14  ;;  %v48_v21 = vld [vmem:[#allocation4 + $0x40] sm:$0xff]  ;;  %v50_v23 = vld [vmem:[#allocation4 + $0x50] sm:$0xff]  ;;  %p2317_p8 = scmp.ne.s32.totalorder %s1718_s17, %s2316_s18  ;;  %p2321_p9 = scmp.lt.s32.totalorder %s1718_s17, %s1718_s17 }
  0x1b   :  { %1729 = vmatpush1.bf16.msra.mxu0 %v2405_v11  ;;  %v2414_v20 = vpack.c.bf16 %v55_v18, %v51_v17  ;;  %v52_v22 = vld [vmem:[#allocation4 + $0x60] sm:$0xff]  ;;  %v54_v25 = vld [vmem:[#allocation4 + $0x70] sm:$0xff]  ;;  %v57_v26 = vld [vmem:[#allocation4 + $0x88] sm:$0xff]  ;;  %p2322_p10 = scmp.lt.s32.totalorder %s2320_s19, %s2316_s18 }
  0x1c   :  { %1761 = vmatpush1.bf16.msra.mxu1 %v2408_v15  ;;  %v2417_v24 = vpack.c.bf16 %v52_v22, %v48_v21  ;;  %v61_v27 = vld [vmem:[#allocation4 + $0xa8] sm:$0xff]  ;;  %1731 = vmatprep.subr.bf16.mxu0 %v2412_v19  ;;  %v2421_v28 = vpack.c.bf16 %v54_v25, %v50_v23  ;;  %v59_v30 = vld [vmem:[#allocation4 + $0x98] sm:$0xff]  ;;  %v56_v32 = vld [vmem:[#allocation4 + $0x80] sm:$0xff] }
  0x1d   :  { %1763 = vmatprep.subr.bf16.mxu1 %v2414_v20  ;;  %v2423_v29 = vpack.c.bf16 %v61_v27, %v57_v26  ;;  %v63_v31 = vld [vmem:[#allocation4 + $0xb8] sm:$0xff]  ;;  %v60_v34 = vld [vmem:[#allocation4 + $0xa0] sm:$0xff]  ;;  %v58_v35 = vld [vmem:[#allocation4 + $0x90] sm:$0xff]  ;;  %p2323_p11 = por %p2322_p10, %p2321_p9 }
  0x1e   :  { %v2425_v33 = vpack.c.bf16 %v63_v31, %v59_v30  ;;  %v62_v36 = vld [vmem:[#allocation4 + $0xb0] sm:$0xff]  ;;  %v2428_v37 = vpack.c.bf16 %v60_v34, %v56_v32  ;;  %v65_v38 = vld [vmem:[#allocation4 + $0xc8] sm:$0xff]  ;;  %v67_v40 = vld [vmem:[#allocation4 + $0xd8] sm:$0xff] }
  0x1f   :  { %1733 = vmatpush1.bf16.msra.mxu0 %v2417_v24  ;;  %v69_v39 = vld [vmem:[#allocation4 + $0xe8] sm:$0xff]  ;;  %v2432_v41 = vpack.c.bf16 %v62_v36, %v58_v35  ;;  %v71_v43 = vld [vmem:[#allocation4 + $0xf8] sm:$0xff]  ;;  %v64_v44 = vld [vmem:[#allocation4 + $0xc0] sm:$0xff]  ;;  %p2324_p12 = pnand %p2323_p11, %p2317_p8 }
  0x20   :  { %1765 = vmatpush1.bf16.msra.mxu1 %v2421_v28  ;;  %1735 = vmatprep.subr.bf16.mxu0 %v2423_v29  ;;  %v2434_v42 = vpack.c.bf16 %v69_v39, %v65_v38  ;;  %v68_v45 = vld [vmem:[#allocation4 + $0xe0] sm:$0xff]  ;;  %v2437_v46 = vpack.c.bf16 %v71_v43, %v67_v40  ;;  %v66_v47 = vld [vmem:[#allocation4 + $0xd0] sm:$0xff]  ;;  %v73_v49 = vld [vmem:[#allocation4 + $0x108] sm:$0xff] }
  0x21   :  { %1767 = vmatprep.subr.bf16.mxu1 %v2425_v33  ;;  %v70_v48 = vld [vmem:[#allocation4 + $0xf0] sm:$0xff]  ;;  %v77_v50 = vld [vmem:[#allocation4 + $0x128] sm:$0xff]  ;;  %v75_v51 = vld [vmem:[#allocation4 + $0x118] sm:$0xff]  ;;  %v2440_v53 = vpack.c.bf16 %v68_v45, %v64_v44 }
  0x22   :  { %v79_v52 = vld [vmem:[#allocation4 + $0x138] sm:$0xff]  ;;  %v2444_v54 = vpack.c.bf16 %v70_v48, %v66_v47  ;;  %v2446_v55 = vpack.c.bf16 %v77_v50, %v73_v49  ;;  %v72_v56 = vld [vmem:[#allocation4 + $0x100] sm:$0xff]  ;;  %v74_v58 = vld [vmem:[#allocation4 + $0x110] sm:$0xff] }
  0x23   :  { %1737 = vmatpush1.bf16.msra.mxu0 %v2428_v37  ;;  %v76_v57 = vld [vmem:[#allocation4 + $0x120] sm:$0xff]  ;;  %v2449_v59 = vpack.c.bf16 %v79_v52, %v75_v51  ;;  %v78_v60 = vld [vmem:[#allocation4 + $0x130] sm:$0xff]  ;;  %v81_v61 = vld [vmem:[#allocation4 + $0x148] sm:$0xff]  ;;  %v112_v51 = vlaneseq }
  0x24   :  { %1769 = vmatpush1.bf16.msra.mxu1 %v2432_v41  ;;  %1739 = vmatprep.subr.bf16.mxu0 %v2434_v42  ;;  %v85_v62 = vld [vmem:[#allocation4 + $0x168] sm:$0xff]  ;;  %v83_v63 = vld [vmem:[#allocation4 + $0x158] sm:$0xff]  ;;  %v2452_v2 = vpack.c.bf16 %v76_v57, %v72_v56  ;;  %v2456_v3 = vpack.c.bf16 %v78_v60, %v74_v58  ;;  %v80_v5 = vld [vmem:[#allocation4 + $0x140] sm:$0xff] }
  0x25   :  { %1771 = vmatprep.subr.bf16.mxu1 %v2437_v46  ;;  %v87_v0 = vld [vmem:[#allocation4 + $0x178] sm:$0xff]  ;;  %v2458_v4 = vpack.c.bf16 %v85_v62, %v81_v61  ;;  %v84_v7 = vld [vmem:[#allocation4 + $0x160] sm:$0xff]  ;;  %v82_v8 = vld [vmem:[#allocation4 + $0x150] sm:$0xff]  ;;  %v113_v52 = vshrl.u32 %v112_v51, 7 }
  0x26   :  { %v2461_v9 = vpack.c.bf16 %v87_v0, %v83_v63  ;;  %v86_v12 = vld [vmem:[#allocation4 + $0x170] sm:$0xff]  ;;  %v89_v13 = vld [vmem:[#allocation4 + $0x188] sm:$0xff]  ;;  %v91_v16 = vld [vmem:[#allocation4 + $0x198] sm:$0xff]  ;;  %v2464_v18 = vpack.c.bf16 %v84_v7, %v80_v5 }
  0x27   :  { %1741 = vmatpush1.bf16.msra.mxu0 %v2440_v53  ;;  %v93_v14 = vld [vmem:[#allocation4 + $0x1a8] sm:$0xff]  ;;  %v95_v17 = vld [vmem:[#allocation4 + $0x1b8] sm:$0xff]  ;;  %v88_v21 = vld [vmem:[#allocation4 + $0x180] sm:$0xff]  ;;  %v2468_v22 = vpack.c.bf16 %v86_v12, %v82_v8  ;;  %v114_v56 = vsub.s32 0, %v113_v52  ;;  %v118_v57 = vsub.s32 1, %v113_v52  ;;  %v122_v58 = vsub.s32 2, %v113_v52 }
  0x28   :  { %1773 = vmatpush1.bf16.msra.mxu1 %v2444_v54  ;;  %1743 = vmatprep.subr.bf16.mxu0 %v2446_v55  ;;  %v2470_v23 = vpack.c.bf16 %v93_v14, %v89_v13  ;;  %v92_v25 = vld [vmem:[#allocation4 + $0x1a0] sm:$0xff]  ;;  %v90_v26 = vld [vmem:[#allocation4 + $0x190] sm:$0xff]  ;;  %v2476_v30 = vpack.c.bf16 %v95_v17, %v91_v16  ;;  %v97_v32 = vld [vmem:[#allocation4 + $0x1c8] sm:$0xff]  ;;  %v126_v60 = vsub.s32 3, %v113_v52 }
  0x29   :  { %1775 = vmatprep.subr.bf16.mxu1 %v2449_v59  ;;  %v104_v27 = vld [vmem:[%s2787_s0] sm:$0xff]  ;;  %v94_v31 = vld [vmem:[#allocation4 + $0x1b0] sm:$0xff]  ;;  %v101_v34 = vld [vmem:[#allocation4 + $0x1e8] sm:$0xff]  ;;  %v2479_v38 = vpack.c.bf16 %v92_v25, %v88_v21 }
  0x2a   :  { %108 = vperm.xlu0 %2245, %v104_v27   ;;  %v99_v35 = vld [vmem:[#allocation4 + $0x1d8] sm:$0xff]  ;;  %v2483_v39 = vpack.c.bf16 %v94_v31, %v90_v26  ;;  %v2485_v40 = vpack.c.bf16 %v101_v34, %v97_v32  ;;  %v96_v43 = vld [vmem:[#allocation4 + $0x1c0] sm:$0xff]  ;;  %v98_v47 = vld [vmem:[#allocation4 + $0x1d0] sm:$0xff] }
  0x2b   :  { %1745 = vmatpush1.bf16.msra.mxu0 %v2452_v2  ;;  %v103_v36 = vld [vmem:[#allocation4 + $0x1f8] sm:$0xff]  ;;  %v100_v44 = vld [vmem:[#allocation4 + $0x1e0] sm:$0xff]  ;;  %v102_v48 = vld [vmem:[#allocation4 + $0x1f0] sm:$0xff] }
  0x2c   :  { %1777 = vmatpush1.bf16.msra.mxu1 %v2456_v3  ;;  %1747 = vmatprep.subr.bf16.mxu0 %v2458_v4  ;;  %v2488_v45 = vpack.c.bf16 %v103_v36, %v99_v35  ;;  %v2491_v49 = vpack.c.bf16 %v100_v44, %v96_v43  ;;  %v2495_v50 = vpack.c.bf16 %v102_v48, %v98_v47  ;;  %v105_v61 = vld [vmem:[%s2788_s1] sm:$0xf]  ;;  %v2347_v35 = vmov 1966171168  }
  0x2d   :  { %1779 = vmatprep.subr.bf16.mxu1 %v2461_v9  ;;  %v136_v62 = vld [vmem:[%s2790_s3] sm:$0xf]  ;;  %v115_v63 = vrot.slane %v105_v61, %v114_v56  ;;  %v119_v0 = vrot.slane %v105_v61, %v118_v57  ;;  %v123_v5 = vrot.slane %v105_v61, %v122_v58  ;;  %v127_v7 = vrot.slane %v105_v61, %v126_v60 }
  0x2e   :  { %v141_v8 = vrot.slane %v136_v62, %v114_v56  ;;  %v145_v12 = vrot.slane %v136_v62, %v118_v57  ;;  %v149_v13 = vrot.slane %v136_v62, %v122_v58  ;;  %v153_v14 = vrot.slane %v136_v62, %v126_v60 }
  0x2f   :  { %1749 = vmatpush1.bf16.msra.mxu0 %v2464_v18  ;;  %v316_v36 = vunpack.c.l.s4 %v2347_v35 }
  0x30   :  { %1781 = vmatpush1.bf16.msra.mxu1 %v2468_v22  ;;  %1751 = vmatprep.subr.bf16.mxu0 %v2470_v23 }
  0x31   :  { %1783 = vmatprep.subr.bf16.mxu1 %v2476_v30  ;;  %v317_v43 = vunpack.c.0.s8 %v316_v36 }
  0x33   :  { %1753 = vmatpush1.bf16.msra.mxu0 %v2479_v38  ;;  %v2544_v44 = vsub.s32 %v317_v43, %v113_v52 }
  0x34   :  { %1785 = vmatpush1.bf16.msra.mxu1 %v2483_v39  ;;  %1755 = vmatprep.subr.bf16.mxu0 %v2485_v40 }
  0x35   :  { %1787 = vmatprep.subr.bf16.mxu1 %v2488_v45 }
  0x37   :  { %1757 = vmatpush1.bf16.msra.mxu0 %v2491_v49 }
  0x38   :  { %1789 = vmatpush1.bf16.msra.mxu1 %v2495_v50  ;;  %1791 = vmatprep.subr.bf16.mxu0 %v2401_v6 }
  0x39   :  { %1823 = vmatprep.subr.bf16.mxu1 %v2403_v10 }
  0x3a   :  { %232 = vmatmul.mubr.f32.vlgmr.msra.gmra.mrb[0].mxu0 %v2345_v1 }
  0x3b   :  { %303 = vmatmul.mubr.f32.vlgmr.msra.gmra.mrb[0].mxu1 %v2345_v1  ;;  %1793 = vmatpush1.bf16.msra.mxu0 %v2405_v11 }
  0x3c   :  { %1825 = vmatpush1.bf16.msra.mxu1 %v2408_v15  ;;  %1795 = vmatprep.subr.bf16.mxu0 %v2412_v19 }
  0x3d   :  { %1827 = vmatprep.subr.bf16.mxu1 %v2414_v20  ;;  %423 = vmatprep.mubr.f32.mxu0 %v2345_v1 }
  0x3e   :  { %494 = vmatprep.mubr.f32.mxu1 %v2345_v1 }
  0x3f   :  { %1797 = vmatpush1.bf16.msra.mxu0 %v2417_v24 }
  0x40   :  { %1829 = vmatpush1.bf16.msra.mxu1 %v2421_v28  ;;  %1799 = vmatprep.subr.bf16.mxu0 %v2423_v29 }
  0x41   :  { %1831 = vmatprep.subr.bf16.mxu1 %v2425_v33 }
  0x43   :  { %1801 = vmatpush1.bf16.msra.mxu0 %v2428_v37 }
  0x44   :  { %1833 = vmatpush1.bf16.msra.mxu1 %v2432_v41  ;;  %1803 = vmatprep.subr.bf16.mxu0 %v2434_v42 }
  0x45   :  { %1835 = vmatprep.subr.bf16.mxu1 %v2437_v46 }
  0x47   :  { %1805 = vmatpush1.bf16.msra.mxu0 %v2440_v53 }
  0x48   :  { %1837 = vmatpush1.bf16.msra.mxu1 %v2444_v54  ;;  %1807 = vmatprep.subr.bf16.mxu0 %v2446_v55 }
  0x49   :  { %1839 = vmatprep.subr.bf16.mxu1 %v2449_v59 }
  0x4b   :  { %1809 = vmatpush1.bf16.msra.mxu0 %v2452_v2 }
  0x4c   :  { %1841 = vmatpush1.bf16.msra.mxu1 %v2456_v3  ;;  %1811 = vmatprep.subr.bf16.mxu0 %v2458_v4 }
  0x4d   :  { %1843 = vmatprep.subr.bf16.mxu1 %v2461_v9 }
  0x4f   :  { %1813 = vmatpush1.bf16.msra.mxu0 %v2464_v18 }
  0x50   :  { %1845 = vmatpush1.bf16.msra.mxu1 %v2468_v22  ;;  %1815 = vmatprep.subr.bf16.mxu0 %v2470_v23 }
  0x51   :  { %1847 = vmatprep.subr.bf16.mxu1 %v2476_v30 }
  0x53   :  { %1817 = vmatpush1.bf16.msra.mxu0 %v2479_v38 }
  0x54   :  { %1849 = vmatpush1.bf16.msra.mxu1 %v2483_v39  ;;  %1819 = vmatprep.subr.bf16.mxu0 %v2485_v40 }
  0x55   :  { %1851 = vmatprep.subr.bf16.mxu1 %v2488_v45 }
  0x57   :  { %1821 = vmatpush1.bf16.msra.mxu0 %v2491_v49 }
  0x58   :  { %1853 = vmatpush1.bf16.msra.mxu1 %v2495_v50  ;;  %1855 = vmatprep.subr.bf16.mxu0 %v2401_v6 }
  0x59   :  { %1887 = vmatprep.subr.bf16.mxu1 %v2403_v10 }
  0xa9   :  { %v109_v16 = vpop.permute.xlu0 %108 }
  0xaa   :  { %v132_v17 = vmul.f32 %v115_v63, %v109_v16  ;;  %v133_v21 = vmul.f32 %v119_v0, %v109_v16  ;;  %v134_v25 = vmul.f32 %v123_v5, %v109_v16  ;;  %v135_v26 = vmul.f32 %v127_v7, %v109_v16 }
  0xac   :  { %v158_v27 = vadd.f32 %v141_v8, %v132_v17  ;;  %v159_v31 = vadd.f32 %v145_v12, %v133_v21  ;;  %v160_v32 = vadd.f32 %v149_v13, %v134_v25  ;;  %v161_v34 = vadd.f32 %v153_v14, %v135_v26 }
  0xae   :  { %162 = vst [vmem:[#allocation2] sm:$0xff] %v158_v27  ;;  %163 = vst [vmem:[#allocation2 + $0x8] sm:$0xff] %v159_v31 }
  0xaf   :  { %164 = vst [vmem:[#allocation2 + $0x10] sm:$0xff] %v160_v32  ;;  %165 = vst [vmem:[#allocation2 + $0x18] sm:$0xff] %v161_v34 }
  0xb6   :  { %v166_v63 = vld [vmem:[#allocation2] ss:$8 sm:$0xf] }
 0x10d   :  { %v233_v47 = vpop.f32.mrb[0].mxu0 }
 0x10e   :  { %v304_v48 = vpop.f32.mrb[0].mxu1  ;;  %v235_v51 = vpop.f32.mrb[1].mxu0 }
 0x10f   :  { %v313_v56 = vcombine.low %v233_v47, %v235_v51  ;;  %v306_v57 = vpop.f32.mrb[1].mxu1 }
 0x110   :  { %v314_v58 = vcombine.low %v304_v48, %v306_v57 }
 0x111   :  { %v321_v60 = vrot.slane %v313_v56, %v2544_v44 }
 0x112   :  { %v328_v61 = vrot.slane %v314_v58, %v2544_v44  ;;  %v358_v58 = vld [vmem:[#allocation2 + $0x1] ss:$8 sm:$0xf] }
 0x114   :  { %v329_v62 = vcombine.low %v321_v60, %v328_v61 }
 0x116   :  { %v336_v0 = vrot.slane %v329_v62, %v2544_v44 }
 0x118   :  { %v338_v5 = vadd.f32 %v336_v0, %v166_v63 }
 0x11a   :  { %v339_v7 = vmul.f32 0.5, %v338_v5  ;;  %v344_v8 = vrot.slane %v338_v5, 3 }
 0x11c   :  { %2246 = vtanh.f32 %v339_v7 }
 0x11d   :  { %2248 = vtanh.f32 %v344_v8 }
 0x126   :  { %v2247_v52 = vpop.eup %2246 }
 0x127   :  { %v341_v12 = vmul.f32 0.5, %v2247_v52  ;;  %v2249_v16 = vpop.eup %2248 }
 0x129   :  { %v342_v13 = vadd.f32 0.5, %v341_v12 }
 0x12b   :  { %v348_v14 = vrot.slane %v342_v13, 1  ;;  %v351_v21 = vmul.f32 %v2249_v16, %v342_v13  ;;  %v354_v26 = vrot.slane %v342_v13, 2 }
 0x12d   :  { %v350_v17 = vmul.f32 0.0, %v348_v14 }
 0x12f   :  { %v352_v25 = vadd.f32 %v351_v21, %v350_v17 }
 0x131   :  { %2250 = vtanh.f32 %v352_v25 }
 0x13b   :  { %v2251_v27 = vpop.eup %2250 }
 0x13c   :  { %v356_v31 = vmul.f32 %v2251_v27, %v354_v26 }
 0x13e   :  { %424 = vmatmul.mubr.f32.vlgmr.msra.gmra.mrb[2].mxu0 %v356_v31  ;;  %495 = vmatmul.mubr.f32.vlgmr.msra.gmra.mrb[2].mxu1 %v356_v31 }
 0x13f   :  { %1857 = vmatpush1.bf16.msra.mxu0 %v2405_v11  ;;  %1889 = vmatpush1.bf16.msra.mxu1 %v2408_v15 }
 0x140   :  { %1859 = vmatprep.subr.bf16.mxu0 %v2412_v19  ;;  %1891 = vmatprep.subr.bf16.mxu1 %v2414_v20 }
 0x141   :  { %615 = vmatprep.mubr.f32.mxu0 %v2345_v1  ;;  %686 = vmatprep.mubr.f32.mxu1 %v2345_v1 }
 0x143   :  { %1861 = vmatpush1.bf16.msra.mxu0 %v2417_v24  ;;  %1893 = vmatpush1.bf16.msra.mxu1 %v2421_v28 }
 0x144   :  { %1863 = vmatprep.subr.bf16.mxu0 %v2423_v29  ;;  %1895 = vmatprep.subr.bf16.mxu1 %v2425_v33 }
 0x147   :  { %1865 = vmatpush1.bf16.msra.mxu0 %v2428_v37  ;;  %1897 = vmatpush1.bf16.msra.mxu1 %v2432_v41 }
 0x148   :  { %1867 = vmatprep.subr.bf16.mxu0 %v2434_v42  ;;  %1899 = vmatprep.subr.bf16.mxu1 %v2437_v46 }
 0x14b   :  { %1869 = vmatpush1.bf16.msra.mxu0 %v2440_v53  ;;  %1901 = vmatpush1.bf16.msra.mxu1 %v2444_v54 }
 0x14c   :  { %1871 = vmatprep.subr.bf16.mxu0 %v2446_v55  ;;  %1903 = vmatprep.subr.bf16.mxu1 %v2449_v59 }
 0x14f   :  { %1873 = vmatpush1.bf16.msra.mxu0 %v2452_v2  ;;  %1905 = vmatpush1.bf16.msra.mxu1 %v2456_v3 }
 0x150   :  { %1875 = vmatprep.subr.bf16.mxu0 %v2458_v4  ;;  %1907 = vmatprep.subr.bf16.mxu1 %v2461_v9 }
 0x153   :  { %1877 = vmatpush1.bf16.msra.mxu0 %v2464_v18  ;;  %1909 = vmatpush1.bf16.msra.mxu1 %v2468_v22 }
 0x154   :  { %1879 = vmatprep.subr.bf16.mxu0 %v2470_v23  ;;  %1911 = vmatprep.subr.bf16.mxu1 %v2476_v30 }
 0x157   :  { %1881 = vmatpush1.bf16.msra.mxu0 %v2479_v38  ;;  %1913 = vmatpush1.bf16.msra.mxu1 %v2483_v39 }
 0x158   :  { %1883 = vmatprep.subr.bf16.mxu0 %v2485_v40  ;;  %1915 = vmatprep.subr.bf16.mxu1 %v2488_v45 }
 0x15b   :  { %1885 = vmatpush1.bf16.msra.mxu0 %v2491_v49  ;;  %1917 = vmatpush1.bf16.msra.mxu1 %v2495_v50 }
 0x15c   :  { %1919 = vmatprep.subr.bf16.mxu0 %v2401_v6  ;;  %1951 = vmatprep.subr.bf16.mxu1 %v2403_v10 }
 0x211   :  { %v425_v32 = vpop.f32.mrb[2].mxu0  ;;  %v496_v34 = vpop.f32.mrb[2].mxu1 }
 0x212   :  { %v427_v35 = vpop.f32.mrb[3].mxu0  ;;  %v498_v36 = vpop.f32.mrb[3].mxu1 }
 0x213   :  { %v505_v43 = vcombine.low %v425_v32, %v427_v35  ;;  %v506_v47 = vcombine.low %v496_v34, %v498_v36 }
 0x215   :  { %v513_v48 = vrot.slane %v505_v43, %v2544_v44  ;;  %v520_v51 = vrot.slane %v506_v47, %v2544_v44  ;;  %v550_v47 = vld [vmem:[#allocation2 + $0x2] ss:$8 sm:$0xf] }
 0x217   :  { %v521_v56 = vcombine.low %v513_v48, %v520_v51 }
 0x219   :  { %v528_v57 = vrot.slane %v521_v56, %v2544_v44 }
 0x21b   :  { %v530_v60 = vadd.f32 %v528_v57, %v358_v58 }
 0x21d   :  { %v531_v61 = vmul.f32 0.5, %v530_v60  ;;  %v536_v62 = vrot.slane %v530_v60, 3 }
 0x21f   :  { %2252 = vtanh.f32 %v531_v61 }
 0x220   :  { %2254 = vtanh.f32 %v536_v62 }
 0x229   :  { %v2253_v63 = vpop.eup %2252 }
 0x22a   :  { %v533_v0 = vmul.f32 0.5, %v2253_v63  ;;  %v2255_v8 = vpop.eup %2254 }
 0x22c   :  { %v534_v5 = vadd.f32 0.5, %v533_v0 }
 0x22e   :  { %v540_v7 = vrot.slane %v534_v5, 1  ;;  %v543_v12 = vmul.f32 %v2255_v8, %v534_v5  ;;  %v546_v14 = vrot.slane %v534_v5, 2 }
 0x230   :  { %v542_v52 = vmul.f32 %v540_v7, %v352_v25 }
 0x232   :  { %v544_v13 = vadd.f32 %v543_v12, %v542_v52 }
 0x234   :  { %2256 = vtanh.f32 %v544_v13 }
 0x23e   :  { %v2257_v16 = vpop.eup %2256 }
 0x23f   :  { %v548_v17 = vmul.f32 %v2257_v16, %v546_v14 }
 0x241   :  { %616 = vmatmul.mubr.f32.vlgmr.msra.gmra.mrb[4].mxu0 %v548_v17  ;;  %687 = vmatmul.mubr.f32.vlgmr.msra.gmra.mrb[4].mxu1 %v548_v17 }
 0x242   :  { %1921 = vmatpush1.bf16.msra.mxu0 %v2405_v11  ;;  %1953 = vmatpush1.bf16.msra.mxu1 %v2408_v15 }
 0x243   :  { %1923 = vmatprep.subr.bf16.mxu0 %v2412_v19  ;;  %1955 = vmatprep.subr.bf16.mxu1 %v2414_v20 }
 0x244   :  { %807 = vmatprep.mubr.f32.mxu0 %v2345_v1  ;;  %878 = vmatprep.mubr.f32.mxu1 %v2345_v1 }
 0x246   :  { %1925 = vmatpush1.bf16.msra.mxu0 %v2417_v24  ;;  %1957 = vmatpush1.bf16.msra.mxu1 %v2421_v28 }
 0x247   :  { %1927 = vmatprep.subr.bf16.mxu0 %v2423_v29  ;;  %1959 = vmatprep.subr.bf16.mxu1 %v2425_v33 }
 0x24a   :  { %1929 = vmatpush1.bf16.msra.mxu0 %v2428_v37  ;;  %1961 = vmatpush1.bf16.msra.mxu1 %v2432_v41 }
 0x24b   :  { %1931 = vmatprep.subr.bf16.mxu0 %v2434_v42  ;;  %1963 = vmatprep.subr.bf16.mxu1 %v2437_v46 }
 0x24e   :  { %1933 = vmatpush1.bf16.msra.mxu0 %v2440_v53  ;;  %1965 = vmatpush1.bf16.msra.mxu1 %v2444_v54 }
 0x24f   :  { %1935 = vmatprep.subr.bf16.mxu0 %v2446_v55  ;;  %1967 = vmatprep.subr.bf16.mxu1 %v2449_v59 }
 0x252   :  { %1937 = vmatpush1.bf16.msra.mxu0 %v2452_v2  ;;  %1969 = vmatpush1.bf16.msra.mxu1 %v2456_v3 }
 0x253   :  { %1939 = vmatprep.subr.bf16.mxu0 %v2458_v4  ;;  %1971 = vmatprep.subr.bf16.mxu1 %v2461_v9 }
 0x256   :  { %1941 = vmatpush1.bf16.msra.mxu0 %v2464_v18  ;;  %1973 = vmatpush1.bf16.msra.mxu1 %v2468_v22 }
 0x257   :  { %1943 = vmatprep.subr.bf16.mxu0 %v2470_v23  ;;  %1975 = vmatprep.subr.bf16.mxu1 %v2476_v30 }
 0x25a   :  { %1945 = vmatpush1.bf16.msra.mxu0 %v2479_v38  ;;  %1977 = vmatpush1.bf16.msra.mxu1 %v2483_v39 }
 0x25b   :  { %1947 = vmatprep.subr.bf16.mxu0 %v2485_v40  ;;  %1979 = vmatprep.subr.bf16.mxu1 %v2488_v45 }
 0x25e   :  { %1949 = vmatpush1.bf16.msra.mxu0 %v2491_v49  ;;  %1981 = vmatpush1.bf16.msra.mxu1 %v2495_v50 }
 0x25f   :  { %1983 = vmatprep.subr.bf16.mxu0 %v2401_v6  ;;  %2015 = vmatprep.subr.bf16.mxu1 %v2403_v10 }
 0x314   :  { %v617_v21 = vpop.f32.mrb[4].mxu0  ;;  %v688_v25 = vpop.f32.mrb[4].mxu1 }
 0x315   :  { %v619_v26 = vpop.f32.mrb[5].mxu0  ;;  %v690_v27 = vpop.f32.mrb[5].mxu1 }
 0x316   :  { %v697_v31 = vcombine.low %v617_v21, %v619_v26  ;;  %v698_v32 = vcombine.low %v688_v25, %v690_v27 }
 0x318   :  { %v705_v34 = vrot.slane %v697_v31, %v2544_v44  ;;  %v712_v35 = vrot.slane %v698_v32, %v2544_v44  ;;  %v742_v32 = vld [vmem:[#allocation2 + $0x3] ss:$8 sm:$0xf] }
 0x31a   :  { %v713_v36 = vcombine.low %v705_v34, %v712_v35 }
 0x31c   :  { %v720_v43 = vrot.slane %v713_v36, %v2544_v44 }
 0x31e   :  { %v722_v48 = vadd.f32 %v720_v43, %v550_v47 }
 0x320   :  { %v723_v51 = vmul.f32 0.5, %v722_v48  ;;  %v728_v56 = vrot.slane %v722_v48, 3 }
 0x322   :  { %2258 = vtanh.f32 %v723_v51 }
 0x323   :  { %2260 = vtanh.f32 %v728_v56 }
 0x32c   :  { %v2259_v57 = vpop.eup %2258 }
 0x32d   :  { %v725_v58 = vmul.f32 0.5, %v2259_v57  ;;  %v2261_v62 = vpop.eup %2260 }
 0x32f   :  { %v726_v60 = vadd.f32 0.5, %v725_v58 }
 0x331   :  { %v732_v61 = vrot.slane %v726_v60, 1  ;;  %v735_v0 = vmul.f32 %v2261_v62, %v726_v60  ;;  %v738_v7 = vrot.slane %v726_v60, 2 }
 0x333   :  { %v734_v63 = vmul.f32 %v732_v61, %v544_v13 }
 0x335   :  { %v736_v5 = vadd.f32 %v735_v0, %v734_v63 }
 0x337   :  { %2262 = vtanh.f32 %v736_v5 }
 0x341   :  { %v2263_v8 = vpop.eup %2262 }
 0x342   :  { %v740_v52 = vmul.f32 %v2263_v8, %v738_v7 }
 0x344   :  { %808 = vmatmul.mubr.f32.vlgmr.msra.gmra.mrb[6].mxu0 %v740_v52  ;;  %879 = vmatmul.mubr.f32.vlgmr.msra.gmra.mrb[6].mxu1 %v740_v52 }
 0x345   :  { %1985 = vmatpush1.bf16.msra.mxu0 %v2405_v11  ;;  %2017 = vmatpush1.bf16.msra.mxu1 %v2408_v15 }
 0x346   :  { %1987 = vmatprep.subr.bf16.mxu0 %v2412_v19  ;;  %2019 = vmatprep.subr.bf16.mxu1 %v2414_v20 }
 0x347   :  { %999 = vmatprep.mubr.f32.mxu0 %v2345_v1  ;;  %1070 = vmatprep.mubr.f32.mxu1 %v2345_v1 }
 0x349   :  { %1989 = vmatpush1.bf16.msra.mxu0 %v2417_v24  ;;  %2021 = vmatpush1.bf16.msra.mxu1 %v2421_v28 }
 0x34a   :  { %1991 = vmatprep.subr.bf16.mxu0 %v2423_v29  ;;  %2023 = vmatprep.subr.bf16.mxu1 %v2425_v33 }
 0x34d   :  { %1993 = vmatpush1.bf16.msra.mxu0 %v2428_v37  ;;  %2025 = vmatpush1.bf16.msra.mxu1 %v2432_v41 }
 0x34e   :  { %1995 = vmatprep.subr.bf16.mxu0 %v2434_v42  ;;  %2027 = vmatprep.subr.bf16.mxu1 %v2437_v46 }
 0x351   :  { %1997 = vmatpush1.bf16.msra.mxu0 %v2440_v53  ;;  %2029 = vmatpush1.bf16.msra.mxu1 %v2444_v54 }
 0x352   :  { %1999 = vmatprep.subr.bf16.mxu0 %v2446_v55  ;;  %2031 = vmatprep.subr.bf16.mxu1 %v2449_v59 }
 0x355   :  { %2001 = vmatpush1.bf16.msra.mxu0 %v2452_v2  ;;  %2033 = vmatpush1.bf16.msra.mxu1 %v2456_v3 }
 0x356   :  { %2003 = vmatprep.subr.bf16.mxu0 %v2458_v4  ;;  %2035 = vmatprep.subr.bf16.mxu1 %v2461_v9 }
 0x359   :  { %2005 = vmatpush1.bf16.msra.mxu0 %v2464_v18  ;;  %2037 = vmatpush1.bf16.msra.mxu1 %v2468_v22 }
 0x35a   :  { %2007 = vmatprep.subr.bf16.mxu0 %v2470_v23  ;;  %2039 = vmatprep.subr.bf16.mxu1 %v2476_v30 }
 0x35d   :  { %2009 = vmatpush1.bf16.msra.mxu0 %v2479_v38  ;;  %2041 = vmatpush1.bf16.msra.mxu1 %v2483_v39 }
 0x35e   :  { %2011 = vmatprep.subr.bf16.mxu0 %v2485_v40  ;;  %2043 = vmatprep.subr.bf16.mxu1 %v2488_v45 }
 0x361   :  { %2013 = vmatpush1.bf16.msra.mxu0 %v2491_v49  ;;  %2045 = vmatpush1.bf16.msra.mxu1 %v2495_v50 }
 0x362   :  { %2047 = vmatprep.subr.bf16.mxu0 %v2401_v6  ;;  %2079 = vmatprep.subr.bf16.mxu1 %v2403_v10 }
 0x417   :  { %v809_v12 = vpop.f32.mrb[6].mxu0  ;;  %v880_v13 = vpop.f32.mrb[6].mxu1 }
 0x418   :  { %v811_v14 = vpop.f32.mrb[7].mxu0  ;;  %v882_v16 = vpop.f32.mrb[7].mxu1 }
 0x419   :  { %v889_v17 = vcombine.low %v809_v12, %v811_v14  ;;  %v890_v21 = vcombine.low %v880_v13, %v882_v16 }
 0x41b   :  { %v897_v25 = vrot.slane %v889_v17, %v2544_v44  ;;  %v904_v26 = vrot.slane %v890_v21, %v2544_v44  ;;  %v934_v21 = vld [vmem:[#allocation2 + $0x4] ss:$8 sm:$0xf] }
 0x41d   :  { %v905_v27 = vcombine.low %v897_v25, %v904_v26 }
 0x41f   :  { %v912_v31 = vrot.slane %v905_v27, %v2544_v44 }
 0x421   :  { %v914_v34 = vadd.f32 %v912_v31, %v742_v32 }
 0x423   :  { %v915_v35 = vmul.f32 0.5, %v914_v34  ;;  %v920_v36 = vrot.slane %v914_v34, 3 }
 0x425   :  { %2264 = vtanh.f32 %v915_v35 }
 0x426   :  { %2266 = vtanh.f32 %v920_v36 }
 0x42f   :  { %v2265_v43 = vpop.eup %2264 }
 0x430   :  { %v917_v47 = vmul.f32 0.5, %v2265_v43  ;;  %v2267_v56 = vpop.eup %2266 }
 0x432   :  { %v918_v48 = vadd.f32 0.5, %v917_v47 }
 0x434   :  { %v924_v51 = vrot.slane %v918_v48, 1  ;;  %v927_v58 = vmul.f32 %v2267_v56, %v918_v48  ;;  %v930_v61 = vrot.slane %v918_v48, 2 }
 0x436   :  { %v926_v57 = vmul.f32 %v924_v51, %v736_v5 }
 0x438   :  { %v928_v60 = vadd.f32 %v927_v58, %v926_v57 }
 0x43a   :  { %2268 = vtanh.f32 %v928_v60 }
 0x444   :  { %v2269_v62 = vpop.eup %2268 }
 0x445   :  { %v932_v63 = vmul.f32 %v2269_v62, %v930_v61 }
 0x447   :  { %1000 = vmatmul.mubr.f32.vlgmr.msra.gmra.mrb[8].mxu0 %v932_v63  ;;  %1071 = vmatmul.mubr.f32.vlgmr.msra.gmra.mrb[8].mxu1 %v932_v63 }
 0x448   :  { %2049 = vmatpush1.bf16.msra.mxu0 %v2405_v11  ;;  %2081 = vmatpush1.bf16.msra.mxu1 %v2408_v15 }
 0x449   :  { %2051 = vmatprep.subr.bf16.mxu0 %v2412_v19  ;;  %2083 = vmatprep.subr.bf16.mxu1 %v2414_v20 }
 0x44a   :  { %1191 = vmatprep.mubr.f32.mxu0 %v2345_v1  ;;  %1262 = vmatprep.mubr.f32.mxu1 %v2345_v1 }
 0x44c   :  { %2053 = vmatpush1.bf16.msra.mxu0 %v2417_v24  ;;  %2085 = vmatpush1.bf16.msra.mxu1 %v2421_v28 }
 0x44d   :  { %2055 = vmatprep.subr.bf16.mxu0 %v2423_v29  ;;  %2087 = vmatprep.subr.bf16.mxu1 %v2425_v33 }
 0x450   :  { %2057 = vmatpush1.bf16.msra.mxu0 %v2428_v37  ;;  %2089 = vmatpush1.bf16.msra.mxu1 %v2432_v41 }
 0x451   :  { %2059 = vmatprep.subr.bf16.mxu0 %v2434_v42  ;;  %2091 = vmatprep.subr.bf16.mxu1 %v2437_v46 }
 0x454   :  { %2061 = vmatpush1.bf16.msra.mxu0 %v2440_v53  ;;  %2093 = vmatpush1.bf16.msra.mxu1 %v2444_v54 }
 0x455   :  { %2063 = vmatprep.subr.bf16.mxu0 %v2446_v55  ;;  %2095 = vmatprep.subr.bf16.mxu1 %v2449_v59 }
 0x458   :  { %2065 = vmatpush1.bf16.msra.mxu0 %v2452_v2  ;;  %2097 = vmatpush1.bf16.msra.mxu1 %v2456_v3 }
 0x459   :  { %2067 = vmatprep.subr.bf16.mxu0 %v2458_v4  ;;  %2099 = vmatprep.subr.bf16.mxu1 %v2461_v9 }
 0x45c   :  { %2069 = vmatpush1.bf16.msra.mxu0 %v2464_v18  ;;  %2101 = vmatpush1.bf16.msra.mxu1 %v2468_v22 }
 0x45d   :  { %2071 = vmatprep.subr.bf16.mxu0 %v2470_v23  ;;  %2103 = vmatprep.subr.bf16.mxu1 %v2476_v30 }
 0x460   :  { %2073 = vmatpush1.bf16.msra.mxu0 %v2479_v38  ;;  %2105 = vmatpush1.bf16.msra.mxu1 %v2483_v39 }
 0x461   :  { %2075 = vmatprep.subr.bf16.mxu0 %v2485_v40  ;;  %2107 = vmatprep.subr.bf16.mxu1 %v2488_v45 }
 0x464   :  { %2077 = vmatpush1.bf16.msra.mxu0 %v2491_v49  ;;  %2109 = vmatpush1.bf16.msra.mxu1 %v2495_v50 }
 0x465   :  { %2111 = vmatprep.subr.bf16.mxu0 %v2401_v6  ;;  %2143 = vmatprep.subr.bf16.mxu1 %v2403_v10 }
 0x51a   :  { %v1001_v0 = vpop.f32.mrb[8].mxu0  ;;  %v1072_v5 = vpop.f32.mrb[8].mxu1 }
 0x51b   :  { %v1003_v7 = vpop.f32.mrb[9].mxu0  ;;  %v1074_v8 = vpop.f32.mrb[9].mxu1 }
 0x51c   :  { %v1081_v52 = vcombine.low %v1001_v0, %v1003_v7  ;;  %v1082_v12 = vcombine.low %v1072_v5, %v1074_v8 }
 0x51e   :  { %v1089_v13 = vrot.slane %v1081_v52, %v2544_v44  ;;  %v1096_v14 = vrot.slane %v1082_v12, %v2544_v44  ;;  %v1126_v12 = vld [vmem:[#allocation2 + $0x5] ss:$8 sm:$0xf] }
 0x520   :  { %v1097_v16 = vcombine.low %v1089_v13, %v1096_v14 }
 0x522   :  { %v1104_v17 = vrot.slane %v1097_v16, %v2544_v44 }
 0x524   :  { %v1106_v25 = vadd.f32 %v1104_v17, %v934_v21 }
 0x526   :  { %v1107_v26 = vmul.f32 0.5, %v1106_v25  ;;  %v1112_v27 = vrot.slane %v1106_v25, 3 }
 0x528   :  { %2270 = vtanh.f32 %v1107_v26 }
 0x529   :  { %2272 = vtanh.f32 %v1112_v27 }
 0x532   :  { %v2271_v31 = vpop.eup %2270 }
 0x533   :  { %v1109_v32 = vmul.f32 0.5, %v2271_v31  ;;  %v2273_v36 = vpop.eup %2272 }
 0x535   :  { %v1110_v34 = vadd.f32 0.5, %v1109_v32 }
 0x537   :  { %v1116_v35 = vrot.slane %v1110_v34, 1  ;;  %v1119_v47 = vmul.f32 %v2273_v36, %v1110_v34  ;;  %v1122_v51 = vrot.slane %v1110_v34, 2 }
 0x539   :  { %v1118_v43 = vmul.f32 %v1116_v35, %v928_v60 }
 0x53b   :  { %v1120_v48 = vadd.f32 %v1119_v47, %v1118_v43 }
 0x53d   :  { %2274 = vtanh.f32 %v1120_v48 }
 0x547   :  { %v2275_v56 = vpop.eup %2274 }
 0x548   :  { %v1124_v57 = vmul.f32 %v2275_v56, %v1122_v51  ;;  %v1510_v51 = vld [vmem:[#allocation2 + $0x7] ss:$8 sm:$0xf] }
 0x54a   :  { %1192 = vmatmul.mubr.f32.vlgmr.msra.gmra.mrb[10].mxu0 %v1124_v57  ;;  %1263 = vmatmul.mubr.f32.vlgmr.msra.gmra.mrb[10].mxu1 %v1124_v57 }
 0x54b   :  { %2113 = vmatpush1.bf16.msra.mxu0 %v2405_v11  ;;  %2145 = vmatpush1.bf16.msra.mxu1 %v2408_v15 }
 0x54c   :  { %2115 = vmatprep.subr.bf16.mxu0 %v2412_v19  ;;  %2147 = vmatprep.subr.bf16.mxu1 %v2414_v20 }
 0x54d   :  { %1383 = vmatprep.mubr.f32.mxu0 %v2345_v1  ;;  %1454 = vmatprep.mubr.f32.mxu1 %v2345_v1 }
 0x54f   :  { %2117 = vmatpush1.bf16.msra.mxu0 %v2417_v24  ;;  %2149 = vmatpush1.bf16.msra.mxu1 %v2421_v28 }
 0x550   :  { %2119 = vmatprep.subr.bf16.mxu0 %v2423_v29  ;;  %2151 = vmatprep.subr.bf16.mxu1 %v2425_v33 }
 0x553   :  { %2121 = vmatpush1.bf16.msra.mxu0 %v2428_v37  ;;  %2153 = vmatpush1.bf16.msra.mxu1 %v2432_v41 }
 0x554   :  { %2123 = vmatprep.subr.bf16.mxu0 %v2434_v42  ;;  %2155 = vmatprep.subr.bf16.mxu1 %v2437_v46 }
 0x557   :  { %2125 = vmatpush1.bf16.msra.mxu0 %v2440_v53  ;;  %2157 = vmatpush1.bf16.msra.mxu1 %v2444_v54 }
 0x558   :  { %2127 = vmatprep.subr.bf16.mxu0 %v2446_v55  ;;  %2159 = vmatprep.subr.bf16.mxu1 %v2449_v59 }
 0x55b   :  { %2129 = vmatpush1.bf16.msra.mxu0 %v2452_v2  ;;  %2161 = vmatpush1.bf16.msra.mxu1 %v2456_v3 }
 0x55c   :  { %2131 = vmatprep.subr.bf16.mxu0 %v2458_v4  ;;  %2163 = vmatprep.subr.bf16.mxu1 %v2461_v9 }
 0x55f   :  { %2133 = vmatpush1.bf16.msra.mxu0 %v2464_v18  ;;  %2165 = vmatpush1.bf16.msra.mxu1 %v2468_v22 }
 0x560   :  { %2135 = vmatprep.subr.bf16.mxu0 %v2470_v23  ;;  %2167 = vmatprep.subr.bf16.mxu1 %v2476_v30 }
 0x563   :  { %2137 = vmatpush1.bf16.msra.mxu0 %v2479_v38  ;;  %2169 = vmatpush1.bf16.msra.mxu1 %v2483_v39 }
 0x564   :  { %2139 = vmatprep.subr.bf16.mxu0 %v2485_v40  ;;  %2171 = vmatprep.subr.bf16.mxu1 %v2488_v45 }
 0x567   :  { %2141 = vmatpush1.bf16.msra.mxu0 %v2491_v49  ;;  %2173 = vmatpush1.bf16.msra.mxu1 %v2495_v50 }
 0x568   :  { %2175 = vmatprep.subr.bf16.mxu0 %v2401_v6  ;;  %2207 = vmatprep.subr.bf16.mxu1 %v2403_v10 }
 0x61d   :  { %v1193_v58 = vpop.f32.mrb[10].mxu0  ;;  %v1264_v60 = vpop.f32.mrb[10].mxu1 }
 0x61e   :  { %v1195_v61 = vpop.f32.mrb[11].mxu0  ;;  %v1266_v62 = vpop.f32.mrb[11].mxu1 }
 0x61f   :  { %v1273_v63 = vcombine.low %v1193_v58, %v1195_v61  ;;  %v1274_v0 = vcombine.low %v1264_v60, %v1266_v62 }
 0x621   :  { %v1281_v5 = vrot.slane %v1273_v63, %v2544_v44  ;;  %v1288_v7 = vrot.slane %v1274_v0, %v2544_v44 }
 0x623   :  { %v1289_v8 = vcombine.low %v1281_v5, %v1288_v7 }
 0x625   :  { %v1296_v52 = vrot.slane %v1289_v8, %v2544_v44 }
 0x627   :  { %v1298_v13 = vadd.f32 %v1296_v52, %v1126_v12 }
 0x629   :  { %v1299_v14 = vmul.f32 0.5, %v1298_v13  ;;  %v1304_v6 = vrot.slane %v1298_v13, 3 }
 0x62b   :  { %2276 = vtanh.f32 %v1299_v14 }
 0x62c   :  { %2278 = vtanh.f32 %v1304_v6 }
 0x635   :  { %v2277_v10 = vpop.eup %2276 }
 0x636   :  { %v1301_v16 = vmul.f32 0.5, %v2277_v10  ;;  %v2279_v25 = vpop.eup %2278  ;;  %v1707_v10 = vld [vmem:[#allocation3] sm:$0x1] }
 0x638   :  { %v1302_v17 = vadd.f32 0.5, %v1301_v16 }
 0x63a   :  { %v1308_v21 = vrot.slane %v1302_v17, 1  ;;  %v1311_v27 = vmul.f32 %v2279_v25, %v1302_v17  ;;  %v1314_v32 = vrot.slane %v1302_v17, 2 }
 0x63c   :  { %v1310_v26 = vmul.f32 %v1308_v21, %v1120_v48 }
 0x63e   :  { %v1312_v31 = vadd.f32 %v1311_v27, %v1310_v26 }
 0x640   :  { %2280 = vtanh.f32 %v1312_v31 }
 0x64a   :  { %v2281_v34 = vpop.eup %2280 }
 0x64b   :  { %v1316_v35 = vmul.f32 %v2281_v34, %v1314_v32 }
 0x64d   :  { %1384 = vmatmul.mubr.f32.vlgmr.msra.gmra.mrb[12].mxu0 %v1316_v35  ;;  %1455 = vmatmul.mubr.f32.vlgmr.msra.gmra.mrb[12].mxu1 %v1316_v35 }
 0x64e   :  { %2177 = vmatpush1.bf16.msra.mxu0 %v2405_v11  ;;  %2209 = vmatpush1.bf16.msra.mxu1 %v2408_v15 }
 0x64f   :  { %2179 = vmatprep.subr.bf16.mxu0 %v2412_v19  ;;  %2211 = vmatprep.subr.bf16.mxu1 %v2414_v20 }
 0x650   :  { %1575 = vmatprep.mubr.f32.mxu0 %v2345_v1  ;;  %1646 = vmatprep.mubr.f32.mxu1 %v2345_v1 }
 0x652   :  { %2181 = vmatpush1.bf16.msra.mxu0 %v2417_v24  ;;  %2213 = vmatpush1.bf16.msra.mxu1 %v2421_v28 }
 0x653   :  { %2183 = vmatprep.subr.bf16.mxu0 %v2423_v29  ;;  %2215 = vmatprep.subr.bf16.mxu1 %v2425_v33 }
 0x656   :  { %2185 = vmatpush1.bf16.msra.mxu0 %v2428_v37  ;;  %2217 = vmatpush1.bf16.msra.mxu1 %v2432_v41  ;;  %v1318_v41 = vld [vmem:[#allocation2 + $0x6] ss:$8 sm:$0xf] }
 0x657   :  { %2187 = vmatprep.subr.bf16.mxu0 %v2434_v42  ;;  %2219 = vmatprep.subr.bf16.mxu1 %v2437_v46 }
 0x65a   :  { %2189 = vmatpush1.bf16.msra.mxu0 %v2440_v53  ;;  %2221 = vmatpush1.bf16.msra.mxu1 %v2444_v54 }
 0x65b   :  { %2191 = vmatprep.subr.bf16.mxu0 %v2446_v55  ;;  %2223 = vmatprep.subr.bf16.mxu1 %v2449_v59 }
 0x65e   :  { %2193 = vmatpush1.bf16.msra.mxu0 %v2452_v2  ;;  %2225 = vmatpush1.bf16.msra.mxu1 %v2456_v3 }
 0x65f   :  { %2195 = vmatprep.subr.bf16.mxu0 %v2458_v4  ;;  %2227 = vmatprep.subr.bf16.mxu1 %v2461_v9 }
 0x662   :  { %2197 = vmatpush1.bf16.msra.mxu0 %v2464_v18  ;;  %2229 = vmatpush1.bf16.msra.mxu1 %v2468_v22 }
 0x663   :  { %2199 = vmatprep.subr.bf16.mxu0 %v2470_v23  ;;  %2231 = vmatprep.subr.bf16.mxu1 %v2476_v30 }
 0x666   :  { %2201 = vmatpush1.bf16.msra.mxu0 %v2479_v38  ;;  %2233 = vmatpush1.bf16.msra.mxu1 %v2483_v39 }
 0x667   :  { %2203 = vmatprep.subr.bf16.mxu0 %v2485_v40  ;;  %2235 = vmatprep.subr.bf16.mxu1 %v2488_v45 }
 0x66a   :  { %2205 = vmatpush1.bf16.msra.mxu0 %v2491_v49  ;;  %2237 = vmatpush1.bf16.msra.mxu1 %v2495_v50 }
 0x720   :  { %v1385_v1 = vpop.f32.mrb[12].mxu0  ;;  %v1456_v11 = vpop.f32.mrb[12].mxu1 }
 0x721   :  { %v1387_v15 = vpop.f32.mrb[13].mxu0  ;;  %v1458_v19 = vpop.f32.mrb[13].mxu1 }
 0x722   :  { %v1465_v20 = vcombine.low %v1385_v1, %v1387_v15  ;;  %v1466_v24 = vcombine.low %v1456_v11, %v1458_v19 }
 0x724   :  { %v1473_v28 = vrot.slane %v1465_v20, %v2544_v44  ;;  %v1480_v29 = vrot.slane %v1466_v24, %v2544_v44 }
 0x726   :  { %v1481_v33 = vcombine.low %v1473_v28, %v1480_v29 }
 0x728   :  { %v1488_v37 = vrot.slane %v1481_v33, %v2544_v44 }
 0x72a   :  { %v1490_v42 = vadd.f32 %v1488_v37, %v1318_v41 }
 0x72c   :  { %v1491_v46 = vmul.f32 0.5, %v1490_v42  ;;  %v1496_v53 = vrot.slane %v1490_v42, 3 }
 0x72e   :  { %2282 = vtanh.f32 %v1491_v46 }
 0x72f   :  { %2284 = vtanh.f32 %v1496_v53 }
 0x738   :  { %v2283_v54 = vpop.eup %2282 }
 0x739   :  { %v1493_v55 = vmul.f32 0.5, %v2283_v54  ;;  %v2285_v3 = vpop.eup %2284 }
 0x73b   :  { %v1494_v59 = vadd.f32 0.5, %v1493_v55 }
 0x73d   :  { %v1500_v2 = vrot.slane %v1494_v59, 1  ;;  %v1503_v9 = vmul.f32 %v2285_v3, %v1494_v59  ;;  %v1506_v22 = vrot.slane %v1494_v59, 2 }
 0x73f   :  { %v1502_v4 = vmul.f32 %v1500_v2, %v1312_v31 }
 0x741   :  { %v1504_v18 = vadd.f32 %v1503_v9, %v1502_v4 }
 0x743   :  { %2286 = vtanh.f32 %v1504_v18 }
 0x74d   :  { %v2287_v23 = vpop.eup %2286 }
 0x74e   :  { %v1508_v30 = vmul.f32 %v2287_v23, %v1506_v22 }
 0x750   :  { %1576 = vmatmul.mubr.f32.vlgmr.msra.gmra.mrb[14].mxu0 %v1508_v30  ;;  %1647 = vmatmul.mubr.f32.vlgmr.msra.gmra.mrb[14].mxu1 %v1508_v30 }
 0x823   :  { %v1577_v38 = vpop.f32.mrb[14].mxu0  ;;  %v1648_v39 = vpop.f32.mrb[14].mxu1 }
 0x824   :  { %v1579_v40 = vpop.f32.mrb[15].mxu0  ;;  %v1650_v45 = vpop.f32.mrb[15].mxu1 }
 0x825   :  { %v1657_v49 = vcombine.low %v1577_v38, %v1579_v40  ;;  %v1658_v50 = vcombine.low %v1648_v39, %v1650_v45 }
 0x827   :  { %v1665_v36 = vrot.slane %v1657_v49, %v2544_v44  ;;  %v1672_v43 = vrot.slane %v1658_v50, %v2544_v44 }
 0x829   :  { %v1673_v47 = vcombine.low %v1665_v36, %v1672_v43 }
 0x82b   :  { %v1680_v48 = vrot.slane %v1673_v47, %v2544_v44  ;;  %v1701_v44 = vld [vmem:[%s2791_s4] sm:$0x1] }
 0x82d   :  { %v1682_v56 = vadd.f32 %v1680_v48, %v1510_v51 }
 0x82f   :  { %v1683_v57 = vmul.f32 0.5, %v1682_v56  ;;  %v1688_v58 = vrot.slane %v1682_v56, 3 }
 0x831   :  { %2288 = vtanh.f32 %v1683_v57 }
 0x832   :  { %2290 = vtanh.f32 %v1688_v58 }
 0x83b   :  { %v2289_v60 = vpop.eup %2288 }
 0x83c   :  { %v1685_v61 = vmul.f32 0.5, %v2289_v60  ;;  %v2291_v0 = vpop.eup %2290 }
 0x83e   :  { %v1686_v62 = vadd.f32 0.5, %v1685_v61 }
 0x840   :  { %v1692_v63 = vrot.slane %v1686_v62, 1  ;;  %v1695_v7 = vmul.f32 %v2291_v0, %v1686_v62  ;;  %v1698_v52 = vrot.slane %v1686_v62, 2 }
 0x842   :  { %v1694_v5 = vmul.f32 %v1692_v63, %v1504_v18 }
 0x844   :  { %v1696_v8 = vadd.f32 %v1695_v7, %v1694_v5 }
 0x846   :  { %2292 = vtanh.f32 %v1696_v8 }
 0x850   :  { %v2293_v12 = vpop.eup %2292 }
 0x851   :  { %v1700_v13 = vmul.f32 %v2293_v12, %v1698_v52 }
 0x853   :  { %v1702_v14 = vmul.f32 %v1701_v44, %v1700_v13 }
 0x855   :  { %v1704_v6 = vsel %vm1703_vm0, %v1702_v14, 0.0 }
 0x856   :  { %1705 = vadd.xlane.f32.xlu0 %v1704_v6 }
 0x8e3   :  { %v1706_v16 = vpop.xlane.xlu0 %1705 }
 0x8e4   :  { %v1708_v17 = vadd.f32 %v1707_v10, %v1706_v16 }
 0x8e6   :  { %1710 = vst.msk [vmem:[#allocation7] sm:$0x1] %vm1709_vm1, %v1708_v17 }
 0x8e7   :  { %2327 = shalt.err (!%p2324_p12)
}
 0x8e8   :  { %s2328_s21 = scalar_lea.hbm %s2793_s6, 16 }
 0x8e9   :  { %p2329_p13 = scmp.ne.s32.totalorder %s2793_s6, %s2328_s21  ;;  %p2332_p0 = scmp.lt.u32.totalorder %s2328_s21, %s2793_s6 }
 0x8eb   :  { %p2334_p1 = pnand %p2332_p0, %p2329_p13 }
 0x8ed   :  { %2337 = shalt.err (!%p2334_p1)
}
 0x8ee   :  { %1720 = dma.vmem_to_hbm [thread:$0]  %s1718_s17, 16, %s2793_s6, [#allocation6]  }
 0x8ef   :  { %2340 = dma.done.wait [#allocation6], 16  }
 0x8f0   :  { %2341 = vsyncadd [#allocation6], 4294967280 }
 0x8f1   :  { %1724 = vsyncpa [#allocation5], 1 }
 0x8f2   :  { %1725 = vsyncpa [#allocation6], 1 }

</bundles_post_ra>
